<compile_context>
chip_gen: v7x
topology: tpu7x:2x2x1
jax: 0.10.0
libtpu: 0.0.40
codegen_flags: <defaults>
</compile_context>

<pallas_src>
import jax
import jax.numpy as jnp
from jax.experimental import pallas as pl
from jax.experimental.pallas import tpu as pltpu

HID1 = 256
HID2 = 128
LEAKY_SLOPE = 0.01


def _leaky_relu(h):
    # f32 elementwise LeakyReLU(negative_slope=0.01)
    return jnp.where(h > 0, h, LEAKY_SLOPE * h)


def _round_up(v, m):
    return ((v + m - 1) // m) * m


def discriminator_kernel(x_ref, w1_ref, b1_ref, w2_ref, b2_ref, w3r_ref, b3_ref,
                         o_ref):
    # x arrives f32; cast to bf16 in-kernel for the MXU (free VPU op).
    x = x_ref[...].astype(jnp.bfloat16)                       # (tile_m, d_in)

    h1 = jnp.dot(x, w1_ref[...], preferred_element_type=jnp.float32)
    h1 = _leaky_relu(h1 + b1_ref[...])                        # f32 (tile_m, 256)

    h2 = jnp.dot(h1.astype(jnp.bfloat16), w2_ref[...],
                 preferred_element_type=jnp.float32)
    h2 = _leaky_relu(h2 + b2_ref[...])                        # f32 (tile_m, 128)

    # Layer 3 (128 -> 1): VPU multiply with the weight row + lane reduction.
    z = jnp.sum(h2 * w3r_ref[...], axis=-1, keepdims=True) + b3_ref[...]
    o_ref[...] = jax.nn.sigmoid(z).astype(o_ref.dtype)        # (tile_m, 1)


def prepare_params(params):
    """One-time prep: bf16 MXU weights for layers 1/2, row-layout w3, (1,1) b3.

    Call once at init / after each optimizer step, not on every forward."""
    w1, b1, w2, b2, w3, b3 = params
    return (w1.astype(jnp.bfloat16), b1,
            w2.astype(jnp.bfloat16), b2,
            w3.reshape(1, HID2).astype(jnp.float32),   # (128,1) -> (1,128) row
            b3.reshape(1, 1).astype(jnp.float32))


def discriminator_forward(x, prepared, *, tile_m=512):
    """x: (B, input_size) float32 -> (B, 1) float32 (sigmoid probability)."""
    w1b, b1, w2b, b2, w3r, b3 = prepared
    B, d_in = x.shape

    # Clamp the batch tile for small B (no dead rows); keep sublane alignment.
    tm = min(tile_m, _round_up(B, 8))
    tm = _round_up(tm, 8)
    n_tiles = pl.cdiv(B, tm)
    Bp = n_tiles * tm
    if Bp != B:
        x = jnp.pad(x, ((0, Bp - B), (0, 0)))

    out = pl.pallas_call(
        discriminator_kernel,
        out_shape=jax.ShapeDtypeStruct((Bp, 1), jnp.float32),
        grid_spec=pl.GridSpec(
            grid=(n_tiles,),
            in_specs=[
                # activations: tiled over batch rows, f32 (cast in-kernel)
                pl.BlockSpec((tm, d_in), lambda i: (i, 0)),
                # weights / biases: full arrays, resident across all tiles
                pl.BlockSpec((d_in, HID1), lambda i: (0, 0)),
                pl.BlockSpec((1, HID1), lambda i: (0, 0)),
                pl.BlockSpec((HID1, HID2), lambda i: (0, 0)),
                pl.BlockSpec((1, HID2), lambda i: (0, 0)),
                pl.BlockSpec((1, HID2), lambda i: (0, 0)),
                pl.BlockSpec((1, 1), lambda i: (0, 0)),
            ],
            # Compact (tile_m, 1) output block: last dim equals the full dim.
            out_specs=pl.BlockSpec((tm, 1), lambda i: (i, 0)),
        ),
        compiler_params=pltpu.CompilerParams(
            dimension_semantics=("parallel",)),
    )(x, w1b, b1, w2b, b2, w3r, b3)

    return out[:B] if Bp != B else out


def init_params(key, input_size):
    """Deterministic init mimicking PyTorch Linear default U[-1/sqrt(fan_in), +].

    Weights stored as (in_features, out_features); biases as (1, out_features)."""
    dims = [(input_size, HID1), (HID1, HID2), (HID2, 1)]
    params = []
    for (fan_in, fan_out) in dims:
        key, kw, kb = jax.random.split(key, 3)
        bound = 1.0 / jnp.sqrt(fan_in)
        w = jax.random.uniform(kw, (fan_in, fan_out), jnp.float32,
                               minval=-bound, maxval=bound)
        b = jax.random.uniform(kb, (1, fan_out), jnp.float32,
                               minval=-bound, maxval=bound)
        params += [w, b]
    return tuple(params)


def reference_forward(x, params):
    """Pure-JAX reference using the same numeric recipe as the kernel:
    bf16 MXU operands / f32 accumulate for layers 1-2, full f32 for layer 3."""
    w1, b1, w2, b2, w3, b3 = params
    bf = jnp.bfloat16
    h1 = jnp.dot(x.astype(bf), w1.astype(bf),
                 preferred_element_type=jnp.float32) + b1
    h1 = _leaky_relu(h1)
    h2 = jnp.dot(h1.astype(bf), w2.astype(bf),
                 preferred_element_type=jnp.float32) + b2
    h2 = _leaky_relu(h2)
    z = jnp.dot(h2, w3) + b3                     # f32, matches VPU layer 3
    return jax.nn.sigmoid(z)


if __name__ == "__main__":
    key = jax.random.PRNGKey(0)
    batch, input_size = 16, 64

    k_x, k_p = jax.random.split(key)
    x = jax.random.normal(k_x, (batch, input_size), jnp.float32)
    params = init_params(k_p, input_size)
    prepared = prepare_params(params)

    out = discriminator_forward(x, prepared)
    out = jax.block_until_ready(out)

    ref = reference_forward(x, params)
    assert out.shape == (batch, 1), out.shape
    assert jnp.allclose(out, ref, atol=2e-3, rtol=2e-3), "mismatch vs reference"

    print("KERNEL_OK")
</pallas_src>

<mosaic_0001>
module attributes {stable_mosaic.version = 11 : i64} {
  func.func @discriminator_kernel(%arg0: i32, %arg1: memref<16x64xf32, #tpu.memory_space<vmem>>, %arg2: memref<64x256xbf16, #tpu.memory_space<vmem>>, %arg3: memref<1x256xf32, #tpu.memory_space<vmem>>, %arg4: memref<256x128xbf16, #tpu.memory_space<vmem>>, %arg5: memref<1x128xf32, #tpu.memory_space<vmem>>, %arg6: memref<1x128xf32, #tpu.memory_space<vmem>>, %arg7: memref<1x1xf32, #tpu.memory_space<vmem>>, %arg8: memref<16x1xf32, #tpu.memory_space<vmem>>) attributes {dimension_semantics = [#tpu.dimension_semantics<parallel>], iteration_bounds = array<i64: 1>, scalar_prefetch = 0 : i64, scratch_operands = 0 : i64, tpu.core_type = #tpu.core_type<tc>, window_params = [{transform_indices = @transform_0, window_bounds = array<i64: 16, 64>}, {pipeline_mode = #tpu.pipeline_mode<synchronous>, transform_indices = @transform_1, window_bounds = array<i64: 64, 256>}, {pipeline_mode = #tpu.pipeline_mode<synchronous>, transform_indices = @transform_2, window_bounds = array<i64: 1, 256>}, {pipeline_mode = #tpu.pipeline_mode<synchronous>, transform_indices = @transform_3, window_bounds = array<i64: 256, 128>}, {pipeline_mode = #tpu.pipeline_mode<synchronous>, transform_indices = @transform_4, window_bounds = array<i64: 1, 128>}, {pipeline_mode = #tpu.pipeline_mode<synchronous>, transform_indices = @transform_5, window_bounds = array<i64: 1, 128>}, {pipeline_mode = #tpu.pipeline_mode<synchronous>, transform_indices = @transform_6, window_bounds = array<i64: 1, 1>}, {transform_indices = @transform_7, window_bounds = array<i64: 16, 1>}]} {
    %c0 = arith.constant 0 : index
    %c0_0 = arith.constant 0 : index
    %0 = vector.load %arg1[%c0, %c0_0] : memref<16x64xf32, #tpu.memory_space<vmem>>, vector<16x64xf32>
    %1 = arith.truncf %0 : vector<16x64xf32> to vector<16x64xbf16>
    %c0_1 = arith.constant 0 : index
    %c0_2 = arith.constant 0 : index
    %2 = vector.load %arg2[%c0_1, %c0_2] : memref<64x256xbf16, #tpu.memory_space<vmem>>, vector<64x256xbf16>
    %cst = arith.constant dense<0.000000e+00> : vector<16x256xf32>
    %3 = tpu.matmul %1, %2, %cst {dimension_numbers = #tpu.dot_dimension_numbers<[1], [0], [0], [1], [0, 0, 1, 1], [], []>} : vector<16x64xbf16>, vector<64x256xbf16>, vector<16x256xf32> -> vector<16x256xf32>
    %c0_3 = arith.constant 0 : index
    %c0_4 = arith.constant 0 : index
    %4 = vector.load %arg3[%c0_3, %c0_4] : memref<1x256xf32, #tpu.memory_space<vmem>>, vector<1x256xf32>
    %5 = vector.broadcast %4 : vector<1x256xf32> to vector<16x256xf32>
    %6 = arith.addf %3, %5 : vector<16x256xf32>
    %cst_5 = arith.constant 0.000000e+00 : f32
    %7 = vector.broadcast %cst_5 : f32 to vector<16x256xf32>
    %8 = arith.cmpf ogt, %6, %7 : vector<16x256xf32>
    %cst_6 = arith.constant 0.00999999977 : f32
    %9 = vector.broadcast %cst_6 : f32 to vector<16x256xf32>
    %10 = arith.mulf %9, %6 : vector<16x256xf32>
    %11 = arith.select %8, %6, %10 : vector<16x256xi1>, vector<16x256xf32>
    %12 = arith.truncf %11 : vector<16x256xf32> to vector<16x256xbf16>
    %c0_7 = arith.constant 0 : index
    %c0_8 = arith.constant 0 : index
    %13 = vector.load %arg4[%c0_7, %c0_8] : memref<256x128xbf16, #tpu.memory_space<vmem>>, vector<256x128xbf16>
    %cst_9 = arith.constant dense<0.000000e+00> : vector<16x128xf32>
    %14 = tpu.matmul %12, %13, %cst_9 {dimension_numbers = #tpu.dot_dimension_numbers<[1], [0], [0], [1], [0, 0, 1, 1], [], []>} : vector<16x256xbf16>, vector<256x128xbf16>, vector<16x128xf32> -> vector<16x128xf32>
    %c0_10 = arith.constant 0 : index
    %c0_11 = arith.constant 0 : index
    %15 = vector.load %arg5[%c0_10, %c0_11] : memref<1x128xf32, #tpu.memory_space<vmem>>, vector<1x128xf32>
    %16 = vector.broadcast %15 : vector<1x128xf32> to vector<16x128xf32>
    %17 = arith.addf %14, %16 : vector<16x128xf32>
    %cst_12 = arith.constant 0.000000e+00 : f32
    %18 = vector.broadcast %cst_12 : f32 to vector<16x128xf32>
    %19 = arith.cmpf ogt, %17, %18 : vector<16x128xf32>
    %cst_13 = arith.constant 0.00999999977 : f32
    %20 = vector.broadcast %cst_13 : f32 to vector<16x128xf32>
    %21 = arith.mulf %20, %17 : vector<16x128xf32>
    %22 = arith.select %19, %17, %21 : vector<16x128xi1>, vector<16x128xf32>
    %c0_14 = arith.constant 0 : index
    %c0_15 = arith.constant 0 : index
    %23 = vector.load %arg6[%c0_14, %c0_15] : memref<1x128xf32, #tpu.memory_space<vmem>>, vector<1x128xf32>
    %24 = vector.broadcast %23 : vector<1x128xf32> to vector<16x128xf32>
    %25 = arith.mulf %22, %24 : vector<16x128xf32>
    %cst_16 = arith.constant dense<0.000000e+00> : vector<16xf32>
    %26 = vector.multi_reduction <add>, %25, %cst_16 [1] : vector<16x128xf32> to vector<16xf32>
    %27 = vector.shape_cast %26 : vector<16xf32> to vector<16x1xf32>
    %c0_17 = arith.constant 0 : index
    %c0_18 = arith.constant 0 : index
    %28 = vector.load %arg7[%c0_17, %c0_18] : memref<1x1xf32, #tpu.memory_space<vmem>>, vector<1x1xf32>
    %29 = vector.broadcast %28 : vector<1x1xf32> to vector<16x1xf32>
    %30 = arith.addf %27, %29 : vector<16x1xf32>
    %31 = arith.negf %30 : vector<16x1xf32>
    %32 = math.exp %31 : vector<16x1xf32>
    %cst_19 = arith.constant 1.000000e+00 : f32
    %33 = vector.broadcast %cst_19 : f32 to vector<16x1xf32>
    %34 = arith.addf %33, %32 : vector<16x1xf32>
    %35 = arith.divf %33, %34 : vector<16x1xf32>
    %c0_20 = arith.constant 0 : index
    %c0_21 = arith.constant 0 : index
    %36 = vector.load %arg8[%c0_20, %c0_21] : memref<16x1xf32, #tpu.memory_space<vmem>>, vector<16x1xf32>
    tpu.vector_store %arg8[%c0_20, %c0_21], %35 {strides = array<i32>} : memref<16x1xf32, #tpu.memory_space<vmem>>, vector<16x1xf32>,
    return
  }
  func.func @transform_0(%arg0: i32) -> (i32, i32) {
    %c0_i32 = arith.constant 0 : i32
    %c0_i32_0 = arith.constant 0 : i32
    return %arg0, %c0_i32 : i32, i32
  }
  func.func @transform_1(%arg0: i32) -> (i32, i32) {
    %c0_i32 = arith.constant 0 : i32
    %c0_i32_0 = arith.constant 0 : i32
    %c0_i32_1 = arith.constant 0 : i32
    return %c0_i32, %c0_i32_0 : i32, i32
  }
  func.func @transform_2(%arg0: i32) -> (i32, i32) {
    %c0_i32 = arith.constant 0 : i32
    %c0_i32_0 = arith.constant 0 : i32
    %c0_i32_1 = arith.constant 0 : i32
    return %c0_i32, %c0_i32_0 : i32, i32
  }
  func.func @transform_3(%arg0: i32) -> (i32, i32) {
    %c0_i32 = arith.constant 0 : i32
    %c0_i32_0 = arith.constant 0 : i32
    %c0_i32_1 = arith.constant 0 : i32
    return %c0_i32, %c0_i32_0 : i32, i32
  }
  func.func @transform_4(%arg0: i32) -> (i32, i32) {
    %c0_i32 = arith.constant 0 : i32
    %c0_i32_0 = arith.constant 0 : i32
    %c0_i32_1 = arith.constant 0 : i32
    return %c0_i32, %c0_i32_0 : i32, i32
  }
  func.func @transform_5(%arg0: i32) -> (i32, i32) {
    %c0_i32 = arith.constant 0 : i32
    %c0_i32_0 = arith.constant 0 : i32
    %c0_i32_1 = arith.constant 0 : i32
    return %c0_i32, %c0_i32_0 : i32, i32
  }
  func.func @transform_6(%arg0: i32) -> (i32, i32) {
    %c0_i32 = arith.constant 0 : i32
    %c0_i32_0 = arith.constant 0 : i32
    %c0_i32_1 = arith.constant 0 : i32
    return %c0_i32, %c0_i32_0 : i32, i32
  }
  func.func @transform_7(%arg0: i32) -> (i32, i32) {
    %c0_i32 = arith.constant 0 : i32
    %c0_i32_0 = arith.constant 0 : i32
    return %arg0, %c0_i32 : i32, i32
  }
}

</mosaic_0001>

<bundles_post_ra>
// kernel: tpu_custom_call.1
= control target key start
LH: loop header
LB: loop body
LE: loop exit
PB: predicated region body
PF: predicated region fallthrough
CT: control target
= control target key end

     0   :  { %s694_s0 = inlined_call_operand.hbm [shape: f32[16,64], index: 0, kind: input, shape index: {}]   ;;  %s695_s1 = inlined_call_operand.hbm [shape: bf16[64,256], index: 1, kind: input, shape index: {}]   ;;  %s696_s2 = inlined_call_operand.vmem [shape: f32[1,256], index: 2, kind: input, shape index: {}]   ;;  %s697_s3 = inlined_call_operand.hbm [shape: bf16[256,128], index: 3, kind: input, shape index: {}]   ;;  %s698_s4 = inlined_call_operand.vmem [shape: f32[1,128], index: 4, kind: input, shape index: {}]   ;;  %s699_s5 = inlined_call_operand.vmem [shape: f32[1,128], index: 5, kind: input, shape index: {}]   ;;  %s700_s6 = inlined_call_operand.<no memory space> [shape: f32[1,1], index: 6, kind: input, shape index: {}]   ;;  %s701_s7 = inlined_call_operand.vmem [shape: f32[16,1], index: 7, kind: output, shape index: {}]  }
   0x1   :  { %v12_v0 = vstv %s700_s6 }
   0x2   :  { %13 = vst [vmem:[#allocation2] sm:$0x1] %v12_v0 }
   0x3   :  { %14 = vsyncpa [#allocation4], 0 }
   0x4   :  { %15 = vsyncpa [#allocation6], 0  ;;  %s585_s26 = smov [#allocation5]   ;;  %s586_s28 = smov [#allocation3]  }
   0x5   :  { %s33_s27 = sshll.u32 %s585_s26, 4  ;;  %s21_s29 = sshll.u32 %s586_s28, 4  ;;  %s34_s27 = int_to_ptr.vmem [resolvable:$true] %s33_s27  ;;  %s636_s29 = int_to_ptr.vmem [resolvable:$true] %s21_s29 }
   0x6   :  { %s515_s9 = scalar_lea.hbm %s695_s1, 1024 }
   0x7   :  { %p516_p0 = scmp.ne.s32.totalorder %s695_s1, %s515_s9  ;;  %p519_p1 = scmp.lt.u32.totalorder %s515_s9, %s695_s1 }
   0x9   :  { %p521_p2 = pnand %p519_p1, %p516_p0 }
   0xb   :  { %524 = shalt.err (!%p521_p2)
}
   0xc   :  { %s525_s13 = scalar_lea.vmem %s34_s27, 1024  ;;  %p530_p4 = scmp.lt.s32.totalorder %s34_s27, %s34_s27 }
   0xd   :  { %p526_p3 = scmp.ne.s32.totalorder %s34_s27, %s525_s13  ;;  %p531_p5 = scmp.lt.s32.totalorder %s525_s13, %s525_s13 }
   0xf   :  { %p532_p6 = por %p531_p5, %p530_p4 }
  0x11   :  { %p533_p7 = pnand %p532_p6, %p526_p3 }
  0x13   :  { %536 = shalt.err (!%p533_p7)
}
  0x14   :  { %s587_s14 = smov 128   ;;  %s588_s15 = smov 8  }
  0x15   :  { %39 = dma.hbm_to_vmem [thread:$0]  %s695_s1, 1024, %s34_s27, [#allocation6], %s587_s14, %s587_s14, %s588_s15  }
  0x16   :  { %s537_s20 = scalar_lea.hbm %s694_s0, 256 }
  0x17   :  { %p538_p8 = scmp.ne.s32.totalorder %s694_s0, %s537_s20  ;;  %p541_p9 = scmp.lt.u32.totalorder %s537_s20, %s694_s0 }
  0x19   :  { %p543_p10 = pnand %p541_p9, %p538_p8 }
  0x1b   :  { %546 = shalt.err (!%p543_p10)
}
  0x1c   :  { %s547_s25 = scalar_lea.vmem %s636_s29, 256  ;;  %p552_p12 = scmp.lt.s32.totalorder %s636_s29, %s636_s29 }
  0x1d   :  { %p548_p11 = scmp.ne.s32.totalorder %s636_s29, %s547_s25  ;;  %p553_p13 = scmp.lt.s32.totalorder %s547_s25, %s547_s25 }
  0x1f   :  { %p554_p0 = por %p553_p13, %p552_p12 }
  0x21   :  { %p555_p1 = pnand %p554_p0, %p548_p11 }
  0x23   :  { %558 = shalt.err (!%p555_p1)
}
  0x24   :  { %27 = dma.hbm_to_vmem [thread:$0]  %s694_s0, 256, %s636_s29, [#allocation4], %s587_s14, %s587_s14, %s588_s15  }
  0x25   :  { %s589_s27 = smov [#allocation7]   ;;  %s559_s9 = scalar_lea.hbm %s697_s3, 2048 }
  0x26   :  { %s47_s28 = sshll.u32 %s589_s27, 4  ;;  %p560_p2 = scmp.ne.s32.totalorder %s697_s3, %s559_s9  ;;  %s48_s28 = int_to_ptr.vmem [resolvable:$true] %s47_s28 }
  0x27   :  { %p563_p3 = scmp.lt.u32.totalorder %s559_s9, %s697_s3 }
  0x29   :  { %p565_p4 = pnand %p563_p3, %p560_p2 }
  0x2b   :  { %568 = shalt.err (!%p565_p4)
}
  0x2c   :  { %s569_s13 = scalar_lea.vmem %s48_s28, 2048  ;;  %p574_p6 = scmp.lt.s32.totalorder %s48_s28, %s48_s28 }
  0x2d   :  { %p570_p5 = scmp.ne.s32.totalorder %s48_s28, %s569_s13  ;;  %p575_p7 = scmp.lt.s32.totalorder %s569_s13, %s569_s13 }
  0x2f   :  { %p576_p8 = por %p575_p7, %p574_p6 }
  0x31   :  { %p577_p9 = pnand %p576_p8, %p570_p5 }
  0x33   :  { %580 = shalt.err (!%p577_p9)
}
  0x34   :  { %s590_s0 = smov 64   ;;  %s591_s29 = smov 4  }
  0x35   :  { %53 = dma.hbm_to_vmem [thread:$0]  %s697_s3, 2048, %s48_s28, [#allocation6], %s590_s0, %s590_s0, %s591_s29  }
  0x36   :  { %581 = dma.done.wait [#allocation4], 256  }
  0x37   :  { %582 = vsyncadd [#allocation4], 4294967040 }
  0x38   :  { %583 = dma.done.wait [#allocation6], 3072  }
  0x39   :  { %584 = vsyncadd [#allocation6], 4294964224  ;;  %v592_v1 = vmov 0   ;;  %v479_v2 = vld [vmem:[#allocation5 + $0x4] ss:$8 sps:$4 sm:$0xff]   ;;  %v70_v13 = vld [vmem:[#allocation3] sm:$0xff]  ;;  %v83_v29 = vlaneseq }
  0x3a   :  { %169 = vmatprep.mubr.bf16.mxu0 %v592_v1  ;;  %v481_v3 = vld [vmem:[#allocation5] ss:$8 sps:$4 sm:$0xff]   ;;  %137 = vmatprep.subr.bf16.mxu0 %v479_v2  ;;  %v482_v4 = vld [vmem:[#allocation5 + $0x14] ss:$8 sps:$4 sm:$0xff]   ;;  %v484_v5 = vld [vmem:[#allocation5 + $0x10] ss:$8 sps:$4 sm:$0xff]  }
  0x3b   :  { %138 = vmatpush1.bf16.msra.mxu0 %v481_v3  ;;  %v485_v6 = vld [vmem:[#allocation5 + $0x24] ss:$8 sps:$4 sm:$0xff]   ;;  %v487_v7 = vld [vmem:[#allocation5 + $0x20] ss:$8 sps:$4 sm:$0xff]   ;;  %v488_v8 = vld [vmem:[#allocation5 + $0x34] ss:$8 sps:$4 sm:$0xff]  }
  0x3c   :  { %139 = vmatprep.subr.bf16.mxu0 %v482_v4  ;;  %v491_v9 = vld [vmem:[#allocation7 + $0x40] sm:$0xff]   ;;  %v493_v11 = vld [vmem:[#allocation7 + $0x48] sm:$0xff]   ;;  %v490_v12 = vld [vmem:[#allocation5 + $0x30] ss:$8 sps:$4 sm:$0xff]   ;;  %vm133_vm0 = vcmask 523264   ;;  %v84_v30 = vshrl.u32 %v83_v29, 7 }
  0x3d   :  { %v492_v10 = vld [vmem:[#allocation7] sm:$0xff]   ;;  %449 = vmatprep.subr.bf16.mxu1 %v491_v9  ;;  %v494_v14 = vld [vmem:[#allocation7 + $0x8] sm:$0xff]   ;;  %v495_v15 = vld [vmem:[#allocation7 + $0x50] sm:$0xff]   ;;  %vm410_vm7 = vcmask 7168  }
  0x3e   :  { %450 = vmatpush3.bf16.msra.mxu1 %v492_v10  ;;  %v71_v16 = vld [vmem:[#allocation3 + $0x8] sm:$0xff]  ;;  %v496_v17 = vld [vmem:[#allocation7 + $0x10] sm:$0xff]   ;;  %v499_v21 = vld [vmem:[#allocation7 + $0x60] sm:$0xff]   ;;  %v85_v31 = vsub.s32 0, %v84_v30  ;;  %v89_v33 = vsub.s32 1, %v84_v30 }
  0x3f   :  { %140 = vmatpush1.bf16.msra.mxu0 %v484_v5  ;;  %451 = vmatprep.subr.bf16.mxu1 %v493_v11  ;;  %v72_v18 = vpack.c.bf16 %v71_v16, %v70_v13  ;;  %v497_v19 = vld [vmem:[#allocation7 + $0x58] sm:$0xff]   ;;  %v500_v22 = vld [vmem:[#allocation7 + $0x20] sm:$0xff]   ;;  %v501_v23 = vld [vmem:[#allocation7 + $0x68] sm:$0xff]  }
  0x40   :  { %141 = vmatprep.subr.bf16.mxu0 %v485_v6  ;;  %v498_v20 = vld [vmem:[#allocation7 + $0x18] sm:$0xff]   ;;  %v502_v24 = vld [vmem:[#allocation7 + $0x28] sm:$0xff]   ;;  %v503_v25 = vld [vmem:[#allocation7 + $0x70] sm:$0xff]  }
  0x41   :  { %v504_v26 = vld [vmem:[#allocation7 + $0x30] sm:$0xff]   ;;  %v505_v27 = vld [vmem:[#allocation7 + $0x78] sm:$0xff]   ;;  %v428_v55 = vld [vmem:[%s698_s4] ss:$0 sm:$0xff] }
  0x42   :  { %452 = vmatpush3.bf16.msra.mxu1 %v494_v14  ;;  %v506_v28 = vld [vmem:[#allocation7 + $0x38] sm:$0xff]   ;;  %v81_v32 = vld [vmem:[%s696_s2] sm:$0x3] }
  0x43   :  { %142 = vmatpush1.bf16.msra.mxu0 %v487_v7  ;;  %453 = vmatprep.subr.bf16.mxu1 %v495_v15  ;;  %v86_v34 = vrot.slane %v81_v32, %v85_v31  ;;  %v90_v35 = vrot.slane %v81_v32, %v89_v33  ;;  %v445_v0 = vld [vmem:[%s699_s5] ss:$0 sm:$0xff] }
  0x44   :  { %143 = vmatprep.subr.bf16.mxu0 %v488_v8  ;;  %v446_v6 = vld [vmem:[#allocation2] ss:$0 sm:$0xff] }
  0x46   :  { %454 = vmatpush3.bf16.msra.mxu1 %v496_v17 }
  0x47   :  { %144 = vmatpush1.bf16.msra.mxu0 %v490_v12  ;;  %455 = vmatprep.subr.bf16.mxu1 %v497_v19 }
  0x4a   :  { %427 = vmatmul.mubr.msk.bf16.vlgmr.msra.gmra.mrb[0].mxu0 %vm133_vm0, %v72_v18  ;;  %456 = vmatpush3.bf16.msra.mxu1 %v498_v20 }
  0x4b   :  { %457 = vmatprep.subr.bf16.mxu1 %v499_v21 }
  0x4e   :  { %458 = vmatpush3.bf16.msra.mxu1 %v500_v22 }
  0x4f   :  { %459 = vmatprep.subr.bf16.mxu1 %v501_v23 }
  0x52   :  { %460 = vmatpush3.bf16.msra.mxu1 %v502_v24 }
  0x53   :  { %461 = vmatprep.subr.bf16.mxu1 %v503_v25 }
  0x56   :  { %462 = vmatpush3.bf16.msra.mxu1 %v504_v26 }
  0x57   :  { %463 = vmatprep.subr.bf16.mxu1 %v505_v27 }
  0x5a   :  { %464 = vmatpush3.bf16.msra.mxu1 %v506_v28 }
 0x11d   :  { %v171_v36 = vpop.f32.mrb[0].mxu0 }
 0x11e   :  { %v172_v37 = vadd.f32 %v171_v36, %v86_v34  ;;  %v173_v38 = vpop.f32.mrb[1].mxu0 }
 0x11f   :  { %v174_v39 = vadd.f32 %v173_v38, %v90_v35  ;;  %v175_v40 = vpop.f32.mrb[2].mxu0 }
 0x120   :  { %v184_v41 = vmul.f32 0.01, %v172_v37  ;;  %v176_v42 = vadd.f32 %v175_v40, %v86_v34  ;;  %v177_v43 = vpop.f32.mrb[3].mxu0  ;;  %vm180_vm1 = vcmp.gt.f32.partialorder %v172_v37, 0.0 }
 0x121   :  { %v185_v44 = vmul.f32 0.01, %v174_v39  ;;  %v178_v45 = vadd.f32 %v177_v43, %v90_v35  ;;  %vm181_vm3 = vcmp.gt.f32.partialorder %v174_v39, 0.0 }
 0x122   :  { %vm182_vm2 = vcmp.gt.f32.partialorder %v176_v42, 0.0  ;;  %v186_v46 = vmul.f32 0.01, %v176_v42  ;;  %v188_v48 = vsel %vm180_vm1, %v172_v37, %v184_v41 }
 0x123   :  { %v187_v47 = vmul.f32 0.01, %v178_v45  ;;  %vm183_vm4 = vcmp.gt.f32.partialorder %v178_v45, 0.0  ;;  %v189_v50 = vsel %vm181_vm3, %v174_v39, %v185_v44 }
 0x124   :  { %v190_v49 = vsel %vm182_vm2, %v176_v42, %v186_v46 }
 0x125   :  { %v191_v51 = vsel %vm183_vm4, %v178_v45, %v187_v47  ;;  %v192_v52 = vpack.c.bf16 %v190_v49, %v188_v48 }
 0x126   :  { %v193_v53 = vpack.c.bf16 %v191_v51, %v189_v50 }
 0x128   :  { %361 = vmatprep.mubr.bf16.mxu1 %v193_v53 }
 0x129   :  { %362 = vmatmul.mubr.bf16.vlgmr.msra.gmra.mrb[0].mxu1 %v192_v52 }
 0x1fc   :  { %v465_v54 = vpop.f32.mrb[0].mxu1 }
 0x1fd   :  { %v466_v56 = vpop.f32.mrb[1].mxu1 }
 0x1fe   :  { %v467_v57 = vadd.f32 %v466_v56, %v465_v54  ;;  %v468_v58 = vpop.f32.mrb[2].mxu1 }
 0x1ff   :  { %v469_v59 = vpop.f32.mrb[3].mxu1 }
 0x200   :  { %v364_v60 = vadd.f32 %v467_v57, %v428_v55  ;;  %v470_v61 = vadd.f32 %v469_v59, %v468_v58 }
 0x202   :  { %v367_v62 = vadd.f32 %v470_v61, %v428_v55  ;;  %vm370_vm5 = vcmp.gt.f32.partialorder %v364_v60, 0.0  ;;  %v372_v63 = vmul.f32 0.01, %v364_v60 }
 0x204   :  { %v374_v1 = vsel %vm370_vm5, %v364_v60, %v372_v63  ;;  %vm371_vm6 = vcmp.gt.f32.partialorder %v367_v62, 0.0  ;;  %v373_v2 = vmul.f32 0.01, %v367_v62 }
 0x205   :  { %v383_v3 = vmul.f32 %v445_v0, %v374_v1 }
 0x206   :  { %v375_v4 = vsel %vm371_vm6, %v367_v62, %v373_v2 }
 0x207   :  { %385 = vadd.xlane.f32.xlu0 %v383_v3  ;;  %v384_v5 = vmul.f32 %v445_v0, %v375_v4 }
 0x20b   :  { %387 = vadd.xlane.f32.xlu0 %v384_v5 }
 0x294   :  { %v386_v7 = vpop.xlane.xlu0 %385 }
 0x295   :  { %v396_v8 = vadd.f32 %v446_v6, %v386_v7 }
 0x297   :  { %v447_v9 = vmul.f32 -1.442695, %v396_v8 }
 0x298   :  { %v388_v10 = vpop.xlane.xlu0 %387 }
 0x299   :  { %507 = vpow2.f32 %v447_v9  ;;  %v397_v11 = vadd.f32 %v446_v6, %v388_v10 }
 0x29b   :  { %v448_v12 = vmul.f32 -1.442695, %v397_v11 }
 0x29d   :  { %509 = vpow2.f32 %v448_v12 }
 0x2a3   :  { %v508_v13 = vpop.eup %507 }
 0x2a4   :  { %v404_v14 = vadd.f32 1.0, %v508_v13 }
 0x2a6   :  { %511 = vrcp.f32 %v404_v14 }
 0x2a7   :  { %v510_v15 = vpop.eup %509 }
 0x2a8   :  { %v405_v16 = vadd.f32 1.0, %v510_v15 }
 0x2aa   :  { %513 = vrcp.f32 %v405_v16 }
 0x2b0   :  { %v512_v17 = vpop.eup %511 }
 0x2b1   :  { %411 = vst.msk [vmem:[%s701_s7] sm:$0xff] %vm410_vm7, %v512_v17 }
 0x2b4   :  { %v514_v18 = vpop.eup %513 }
 0x2b5   :  { %412 = vst.msk [vmem:[%s701_s7 + $0x8] sm:$0xff] %vm410_vm7, %v514_v18 }
 0x2b6   :  { %417 = vsyncpa [#allocation4], 1 }
 0x2b7   :  { %418 = vsyncpa [#allocation6], 1 }

</bundles_post_ra>
